<compile_context>
chip_gen: v6e
topology: v6e:2x2x1
jax: 0.10.0
libtpu: 0.0.40
codegen_flags: <defaults>
</compile_context>

<pallas_src>
import math

import jax
import jax.numpy as jnp
from jax.experimental import pallas as pl
from jax.experimental.pallas import tpu as pltpu


# ----------------------------------------------------------------------------
# Kernels
# ----------------------------------------------------------------------------

def _add_rowvec_kernel(x_ref, emb_ref, o_ref):
    # x_ref: (TB, TL)   emb_ref: (1, TL)   o_ref: (TB, TL)
    # Pure vld / vadd / vst stream; TL is lane-dense, so every store is a
    # full-width vst.  Dtype promotion (e.g. bf16 x + f32 emb) happens here
    # for free — the VPU is idle under the DMA bound.
    o_ref[...] = (x_ref[...] + emb_ref[...]).astype(o_ref.dtype)


def _add_3d_kernel(x_ref, emb_ref, o_ref):
    # Rare fallback when the flattened row can't be made lane-dense
    # ((W*F) % 128 != 0 and B is not a multiple of the fold factor).
    # x_ref: (TB, W, F)   emb_ref: (W, F)   o_ref: (TB, W, F)
    o_ref[...] = (x_ref[...] + emb_ref[...][None, :, :]).astype(o_ref.dtype)


# ----------------------------------------------------------------------------
# Tiling heuristics
# ----------------------------------------------------------------------------

def _cdiv(a, b):
    return -(-a // b)


def _sublane_align(dtype):
    # f32 -> 8, bf16 -> 16, int8/fp8 -> 32 (sub-32-bit dtypes pack along sublanes).
    return max(8, 32 // jnp.dtype(dtype).itemsize)


def _block_target_bytes():
    # v7x per-grid-step overhead is relatively more expensive (3.2 TB/s HBM),
    # so use larger blocks there.
    try:
        kind = jax.devices()[0].device_kind.lower()
    except Exception:
        kind = ""
    if "v7" in kind:
        return 4 << 20
    return 2 << 20


def _choose_tiles(b, l, itemsize, sub, target_bytes):
    """Pick (tb, tl) for a (b, l) array: block ~= target_bytes, tb a multiple
    of `sub` (or == b), tl a multiple of 128 (or == l), and >=4 grid steps on
    mid/large inputs so input prefetch / output writeback actually overlap."""
    total = b * l * itemsize
    if total <= target_bytes:
        return b, l

    rows_per_block = target_bytes // max(l * itemsize, 1)
    if rows_per_block >= sub:
        tb = min(b, (rows_per_block // sub) * sub)
        tl = l
    else:
        # Very wide rows: tile the lane dimension too so one block (and its
        # double buffers) never blows the scoped-VMEM budget.
        tb = min(b, sub)
        lanes = (target_bytes // max(tb * itemsize, 1) // 128) * 128
        tl = min(l, max(128, lanes))

    if total > (4 << 20):
        # Guarantee a few grid steps for steady-state pipelining.
        while _cdiv(b, tb) * _cdiv(l, tl) < 4:
            if tb >= 2 * sub:
                tb = (tb // 2 // sub) * sub
            elif tb == b and b > sub:
                tb = max(sub, (b // 2 // sub) * sub)
            elif tl >= 2 * 128:
                tl = (tl // 2 // 128) * 128
            elif tl == l and l > 128:
                tl = max(128, (l // 2 // 128) * 128)
            else:
                break
    return tb, tl


# ----------------------------------------------------------------------------
# Wrapper
# ----------------------------------------------------------------------------

def learnable_positional_encoding(x, embed_table, *, donate_x=False):
    """Forward of LearnablePositionalEncoding.

    x: (..., W, F); embed_table: (dict_size, F).  Returns
    x + embed_table[:W] broadcast over the leading dims, with PyTorch-style
    dtype promotion.  Set donate_x=True (and donate x at the jit boundary)
    to alias the output onto x's buffer.
    """
    *lead, w, f = x.shape
    dict_size, f_tab = embed_table.shape
    assert f == f_tab, "feature dim must match embedding width"
    assert w <= dict_size, "sequence length exceeds embedding dict_size"

    b = 1
    for d in lead:
        b *= d

    out_dtype = jnp.result_type(x.dtype, embed_table.dtype)
    # Slice only the W rows we need and cast once (hoisted out of the kernel).
    emb = embed_table[:w].astype(out_dtype)

    x_itemsize = jnp.dtype(x.dtype).itemsize
    o_itemsize = jnp.dtype(out_dtype).itemsize
    itemsize = max(x_itemsize, o_itemsize)
    sub = _sublane_align(x.dtype)
    target = _block_target_bytes()
    # 32 MiB scoped VMEM is valid on every generation (>= v5e's 16 MiB default,
    # <= v7x's 64 MiB physical) and holds 2x-in + 2x-out buffers of a <=4 MiB
    # block plus the resident emb slice with ample headroom.
    vmem_limit = 32 * 1024 * 1024

    row = w * f
    # Lane-dense routing: fold k batch rows together when W*F isn't a multiple
    # of 128 lanes, tiling the emb row k times wrapper-side.
    fold = 1
    if row % 128 != 0:
        fold = 128 // math.gcd(row, 128)
        if b == 0 or b % fold != 0:
            fold = 0  # can't fold -> rare 3-D fallback path below

    if fold:
        b2 = b // fold
        l = fold * row
        x2 = x.reshape(b2, l)
        emb_row = emb.reshape(-1)
        if fold > 1:
            emb_row = jnp.tile(emb_row, fold)
        emb2 = emb_row.reshape(1, l)

        tb, tl = _choose_tiles(b2, l, itemsize, sub, target)
        n_l = pl.cdiv(l, tl)
        n_b = pl.cdiv(b2, tb)

        cost = pl.CostEstimate(
            flops=b2 * l,
            transcendentals=0,
            bytes_accessed=b2 * l * (x_itemsize + o_itemsize) + l * o_itemsize,
        )
        aliases = {0: 0} if (donate_x and out_dtype == x.dtype) else {}

        out = pl.pallas_call(
            _add_rowvec_kernel,
            out_shape=jax.ShapeDtypeStruct((b2, l), out_dtype),
            grid_spec=pltpu.PrefetchScalarGridSpec(
                num_scalar_prefetch=0,
                # Lane axis outermost so the emb slice stays VMEM-resident
                # (no re-DMA) across the inner batch axis.
                grid=(n_l, n_b),
                in_specs=[
                    pl.BlockSpec((tb, tl), lambda jl, ib: (ib, jl)),
                    pl.BlockSpec((1, tl), lambda jl, ib: (0, jl)),
                ],
                out_specs=pl.BlockSpec((tb, tl), lambda jl, ib: (ib, jl)),
            ),
            compiler_params=pltpu.CompilerParams(
                dimension_semantics=("parallel", "parallel"),
                vmem_limit_bytes=vmem_limit,
            ),
            cost_estimate=cost,
            input_output_aliases=aliases,
        )(x2, emb2)
        return out.reshape(x.shape)

    # --- Rare fallback: (W*F) % 128 != 0 and B not a multiple of the fold ----
    # TODO(synk): this path still issues masked (F/128-lane) stores; only
    # reachable for odd (W, F, B) combinations.
    x3 = x.reshape(b, w, f)
    row_bytes = row * itemsize
    tb = max(1, min(b, target // max(row_bytes, 1)))
    cost = pl.CostEstimate(
        flops=b * row,
        transcendentals=0,
        bytes_accessed=b * row * (x_itemsize + o_itemsize) + row * o_itemsize,
    )
    aliases = {0: 0} if (donate_x and out_dtype == x.dtype) else {}
    out = pl.pallas_call(
        _add_3d_kernel,
        out_shape=jax.ShapeDtypeStruct((b, w, f), out_dtype),
        grid_spec=pltpu.PrefetchScalarGridSpec(
            num_scalar_prefetch=0,
            grid=(pl.cdiv(b, tb),),
            in_specs=[
                pl.BlockSpec((tb, w, f), lambda i: (i, 0, 0)),
                pl.BlockSpec((w, f), lambda i: (0, 0)),   # resident table slice
            ],
            out_specs=pl.BlockSpec((tb, w, f), lambda i: (i, 0, 0)),
        ),
        compiler_params=pltpu.CompilerParams(
            dimension_semantics=("parallel",),
            vmem_limit_bytes=vmem_limit,
        ),
        cost_estimate=cost,
        input_output_aliases=aliases,
    )(x3, emb)
    return out.reshape(x.shape)


if __name__ == "__main__":
    dict_size = 128
    num_pos_feats = 16

    batch = 2
    seq = 8  # w = x.shape[-2]

    key = jax.random.PRNGKey(0)
    kx, ke = jax.random.split(key)

    # Deterministic "parameters": nn.Embedding default init ~ N(0, 1)
    embed_table = jax.random.normal(ke, (dict_size, num_pos_feats), dtype=jnp.float32)

    # Input x: (batch, seq, num_pos_feats)
    x = jax.random.normal(kx, (batch, seq, num_pos_feats), dtype=jnp.float32)

    out = learnable_positional_encoding(x, embed_table)
    out = jax.block_until_ready(out)

    # Reference check (plain JAX)
    ref = x + embed_table[:seq][None, :, :]
    assert out.shape == x.shape
    assert out.dtype == ref.dtype
    assert jnp.allclose(out, ref, atol=1e-6, rtol=1e-6), "mismatch vs reference"

    print("KERNEL_OK")
</pallas_src>

<mosaic_0001>
module attributes {stable_mosaic.version = 11 : i64} {
  func.func @_add_rowvec_kernel(%arg0: i32, %arg1: i32, %arg2: memref<2x128xf32, #tpu.memory_space<vmem>>, %arg3: memref<1x128xf32, #tpu.memory_space<vmem>>, %arg4: memref<2x128xf32, #tpu.memory_space<vmem>>) attributes {dimension_semantics = [#tpu.dimension_semantics<parallel>, #tpu.dimension_semantics<parallel>], iteration_bounds = array<i64: 1, 1>, scalar_prefetch = 0 : i64, scratch_operands = 0 : i64, tpu.core_type = #tpu.core_type<tc>, window_params = [{transform_indices = @transform_0, window_bounds = array<i64: 2, 128>}, {transform_indices = @transform_1, window_bounds = array<i64: 1, 128>}, {transform_indices = @transform_2, window_bounds = array<i64: 2, 128>}]} {
    %c0 = arith.constant 0 : index
    %c0_0 = arith.constant 0 : index
    %0 = vector.load %arg2[%c0, %c0_0] : memref<2x128xf32, #tpu.memory_space<vmem>>, vector<2x128xf32>
    %c0_1 = arith.constant 0 : index
    %c0_2 = arith.constant 0 : index
    %1 = vector.load %arg3[%c0_1, %c0_2] : memref<1x128xf32, #tpu.memory_space<vmem>>, vector<1x128xf32>
    %2 = vector.broadcast %1 : vector<1x128xf32> to vector<2x128xf32>
    %3 = arith.addf %0, %2 : vector<2x128xf32>
    %c0_3 = arith.constant 0 : index
    %c0_4 = arith.constant 0 : index
    %4 = vector.load %arg4[%c0_3, %c0_4] : memref<2x128xf32, #tpu.memory_space<vmem>>, vector<2x128xf32>
    tpu.vector_store %arg4[%c0_3, %c0_4], %3 {strides = array<i32>} : memref<2x128xf32, #tpu.memory_space<vmem>>, vector<2x128xf32>,
    return
  }
  func.func @transform_0(%arg0: i32, %arg1: i32) -> (i32, i32) {
    %c0_i32 = arith.constant 0 : i32
    return %arg1, %arg0 : i32, i32
  }
  func.func @transform_1(%arg0: i32, %arg1: i32) -> (i32, i32) {
    %c0_i32 = arith.constant 0 : i32
    %c0_i32_0 = arith.constant 0 : i32
    return %c0_i32, %arg0 : i32, i32
  }
  func.func @transform_2(%arg0: i32, %arg1: i32) -> (i32, i32) {
    %c0_i32 = arith.constant 0 : i32
    return %arg1, %arg0 : i32, i32
  }
}

</mosaic_0001>

<bundles_post_ra>
// kernel: tpu_custom_call.1
= control target key start
LH: loop header
LB: loop body
LE: loop exit
PB: predicated region body
PF: predicated region fallthrough
CT: control target
= control target key end

     0   :  { %7 = vsyncpa [#allocation3], 0  ;;  %s122_s0 = inlined_call_operand.hbm [shape: f32[2,128], index: 0, kind: input, shape index: {}]   ;;  %s123_s1 = inlined_call_operand.vmem [shape: f32[1,128], index: 1, kind: input, shape index: {}]   ;;  %s124_s2 = inlined_call_operand.hbm [shape: f32[2,128], index: 2, kind: output, shape index: {}]  }
   0x1   :  { %8 = vsyncpa [#allocation4], 0  ;;  %s96_s9 = smov [#allocation2]  }
   0x2   :  { %s15_s10 = sshll.u32 %s96_s9, 4  ;;  %s16_s10 = int_to_ptr.vmem [resolvable:$true] %s15_s10 }
   0x3   :  { %s60_s11 = scalar_lea.vmem %s16_s10, 32  ;;  %p65_p1 = scmp.lt.s32.totalorder %s16_s10, %s16_s10 }
   0x4   :  { %p61_p0 = scmp.ne.s32.totalorder %s16_s10, %s60_s11  ;;  %p66_p2 = scmp.lt.s32.totalorder %s60_s11, %s60_s11 }
   0x6   :  { %p67_p3 = por %p66_p2, %p65_p1 }
   0x8   :  { %p68_p4 = pnand %p67_p3, %p61_p0 }
   0xa   :  { %71 = shalt.err (!%p68_p4)
}
   0xb   :  { %18 = dma.hbm_to_vmem [thread:$0]  %s122_s0, 32, %s16_s10, [#allocation3]  }
   0xc   :  { %92 = dma.done.wait [#allocation3], 32  }
   0xd   :  { %93 = vsyncadd [#allocation3], 4294967264  ;;  %s97_s14 = smov [#allocation5]   ;;  %v24_v0 = vld [vmem:[#allocation2] sm:$0x3] }
   0xe   :  { %s40_s15 = sshll.u32 %s97_s14, 4  ;;  %v49_v1 = vld [vmem:[%s123_s1] ss:$0 sm:$0xff]  ;;  %s41_s15 = int_to_ptr.vmem [resolvable:$true] %s40_s15 }
   0xf   :  { %v32_v2 = vadd.f32 %v49_v1, %v24_v0  ;;  %s72_s18 = scalar_lea.vmem %s41_s15, 32  ;;  %p77_p6 = scmp.lt.s32.totalorder %s41_s15, %s41_s15 }
  0x10   :  { %p73_p5 = scmp.ne.s32.totalorder %s41_s15, %s72_s18  ;;  %p78_p7 = scmp.lt.s32.totalorder %s72_s18, %s72_s18 }
  0x11   :  { %33 = vst [vmem:[#allocation5] sm:$0x3] %v32_v2 }
  0x12   :  { %p79_p8 = por %p78_p7, %p77_p6 }
  0x14   :  { %p80_p9 = pnand %p79_p8, %p73_p5 }
  0x16   :  { %83 = shalt.err (!%p80_p9)
}
  0x17   :  { %43 = dma.vmem_to_hbm [thread:$0]  %s41_s15, 32, %s124_s2, [#allocation4]  }
  0x18   :  { %94 = dma.done.wait [#allocation4], 32  }
  0x19   :  { %95 = vsyncadd [#allocation4], 4294967264 }
  0x1a   :  { %47 = vsyncpa [#allocation3], 1 }
  0x1b   :  { %48 = vsyncpa [#allocation4], 1 }

</bundles_post_ra>
